<compile_context>
chip_gen: v7x
topology: tpu7x:2x2x1
jax: 0.10.0
libtpu: 0.0.40
codegen_flags: <defaults>
</compile_context>

<pallas_src>
import jax
import jax.numpy as jnp
from jax import lax
from jax.experimental import pallas as pl
from jax.experimental.pallas import tpu as pltpu

# ----------------------------- hyper-parameters -----------------------------
L = 8            # number of leaves (sequence length)
B = 2            # batch size
C_IN = 4         # infeatures
E = 8            # emb_dim
NHEAD = 4
HEAD_DIM = E // NHEAD
FF = 128         # dim_feedforward
H1 = FF // 2     # mlp1 hidden width (dim_feedforward / 2)
NUM_CLASSES = 4
OUT_ROWS = 8     # output padded to a full 8-sublane vreg
NEG_SLOPE = 0.1  # LeakyReLU slope
LN_EPS = 1e-5    # nn.LayerNorm default eps

BL = B * L                    # 16
NBL = NHEAD * BL              # 64
BLL = B * L * L               # 128

# ----------------------- parameter slab (one lane-dense DMA) ----------------
SLAB_LANES = 128

_PACK_LAYOUT = (
    ("w0a", (C_IN, E)), ("b0a", (1, E)),
    ("w0b", (E, E)),    ("b0b", (1, E)),
    ("wqkv", (E, 3 * E)), ("bqkv", (1, 3 * E)),
    ("wo", (E, E)),     ("bo", (1, E)),
    ("g1", (1, E)),     ("be1", (1, E)),
    ("wf1", (E, FF)),   ("bf1", (1, FF)),
    ("wf2T", (E, FF)),  ("bf2", (1, E)),     # wf2 stored transposed: (8,128)
    ("g2", (1, E)),     ("be2", (1, E)),
    ("w1a", (E, H1)),   ("b1a", (1, H1)),
    ("w1bT", (OUT_ROWS, H1)), ("b1bc", (OUT_ROWS, 1)),
    ("hmask", (NBL, E)),          # head lane-mask, heads outermost over B*L
    ("bmask", (NBL, BL)),         # additive batch mask (0 / -1e9)
    ("rsum", (BLL, BL)),          # bridge 'sum' selection matrix
)
_PACK_SHAPES = dict(_PACK_LAYOUT)


def _round8(n):
    return ((n + 7) // 8) * 8


_PACK_OFFSETS = {}
_row = 0
for _name, _shape in _PACK_LAYOUT:
    _PACK_OFFSETS[_name] = _row          # 8-row aligned -> sublane-aligned reads
    _row += _round8(_shape[0])
SLAB_ROWS = _round8(_row)


def pack_params(params):
    """Fuse/transpose torch-layout params + precomputed masks into one slab."""
    (w0a, b0a, w0b, b0b, wq, bq, wk, bk, wv, bv, wo, bo,
     g1, be1, wf1, bf1, wf2, bf2, g2, be2, w1a, b1a, w1b, b1b) = params

    wqkv = jnp.concatenate([wq, wk, wv], axis=1)       # (E, 3E), [Q|K|V]
    bqkv = jnp.concatenate([bq, bk, bv], axis=1)       # (1, 3E)

    # head mask: row r = h*(B*L) + b*L + i ; lane e belongs to head e//HEAD_DIM
    row_head = jnp.arange(NBL) // BL
    col_head = jnp.arange(E) // HEAD_DIM
    hmask = (row_head[:, None] == col_head[None, :]).astype(jnp.float32)

    # additive batch mask on the (NBL, BL) score matrix: 0 same batch, -1e9 off
    row_b = (jnp.arange(NBL) % BL) // L
    col_b = jnp.arange(BL) // L
    bmask = jnp.where(row_b[:, None] == col_b[None, :], 0.0, -1e9
                      ).astype(jnp.float32)

    # bridge 'sum' selection: row m = b*L*L + i*L + j -> +1 at col b*L+i and
    # +1 at col b*L+j (diagonal i==j gets 2, matching u[i]+u[i]).
    m = jnp.arange(BLL)
    bi = (m // (L * L)) * L + (m // L) % L
    bj = (m // (L * L)) * L + m % L
    cols = jnp.arange(BL)
    rsum = ((cols[None, :] == bi[:, None]).astype(jnp.float32)
            + (cols[None, :] == bj[:, None]).astype(jnp.float32))

    # final Linear transposed, zero-padded to 8 output rows
    w1bT = jnp.zeros((OUT_ROWS, H1), jnp.float32).at[:NUM_CLASSES].set(
        jnp.transpose(w1b))
    b1bc = jnp.zeros((OUT_ROWS, 1), jnp.float32).at[:NUM_CLASSES, 0].set(
        b1b.reshape(-1))

    pdict = {
        "w0a": w0a, "b0a": b0a, "w0b": w0b, "b0b": b0b,
        "wqkv": wqkv, "bqkv": bqkv, "wo": wo, "bo": bo,
        "g1": g1, "be1": be1, "wf1": wf1, "bf1": bf1,
        "wf2T": jnp.transpose(wf2), "bf2": bf2, "g2": g2, "be2": be2,
        "w1a": w1a, "b1a": b1a, "w1bT": w1bT, "b1bc": b1bc,
        "hmask": hmask, "bmask": bmask, "rsum": rsum,
    }
    slab = jnp.zeros((SLAB_ROWS, SLAB_LANES), jnp.float32)
    for name, shape in _PACK_LAYOUT:
        off = _PACK_OFFSETS[name]
        arr = pdict[name].astype(jnp.float32).reshape(shape)
        slab = slab.at[off:off + shape[0], 0:shape[1]].set(arr)
    return slab


# --------------------------------- math ------------------------------------
def _leaky(x):
    return jnp.where(x >= 0, x, NEG_SLOPE * x)


def _layernorm(x, gamma, beta):
    mu = jnp.mean(x, axis=-1, keepdims=True)
    var = jnp.mean((x - mu) ** 2, axis=-1, keepdims=True)
    return (x - mu) * lax.rsqrt(var + LN_EPS) * gamma + beta


def _mm(a, b):
    return jnp.dot(a, b, preferred_element_type=jnp.float32)


def _dot_bt(a, b):
    """a @ b.T contracting last dims."""
    return lax.dot_general(a, b, (((1,), (1,)), ((), ())),
                           preferred_element_type=jnp.float32)


# ------------------------------ Pallas kernel -------------------------------
def _kernel(x_ref, p_ref, out_ref):
    def ld(name):
        off = _PACK_OFFSETS[name]
        r, c = _PACK_SHAPES[name]
        return p_ref[off:off + r, 0:c]

    x = x_ref[...]                                        # (B*L, C_IN)

    # mlp0: Linear -> LeakyReLU -> [dropout: identity] -> Linear, then f0
    h = _leaky(_mm(x, ld("w0a")) + ld("b0a"))
    h = _mm(h, ld("w0b")) + ld("b0b")
    h = _leaky(h)                                         # (B*L, E)

    # ---- nn.TransformerEncoderLayer (post-norm, relu FFN, eval mode) ----
    # fused QKV: one MXU push; K/V lane-offset slices realign via XLU only.
    qkv = _mm(h, ld("wqkv")) + ld("bqkv")                 # (B*L, 3E)
    q = qkv[:, 0:E]
    k = qkv[:, E:2 * E]
    v = qkv[:, 2 * E:3 * E]

    hmask = ld("hmask")                                   # (NHEAD*B*L, E)
    bmask = ld("bmask")                                   # (NHEAD*B*L, B*L)
    scale = 1.0 / (HEAD_DIM ** 0.5)

    # whole-batch, all-heads attention: ONE score matmul + ONE context matmul
    qstack = jnp.tile(q, (NHEAD, 1)) * hmask              # (NBL, E)
    s = _dot_bt(qstack, k) * scale + bmask                # (NBL, B*L)
    s = s - jnp.max(s, axis=-1, keepdims=True)
    p = jnp.exp(s)
    p = p * pl.reciprocal(jnp.sum(p, axis=-1, keepdims=True), approx=True)
    ctx = _mm(p, v) * hmask                               # (NBL, E), head-masked
    # heads are outermost -> fold is 3 sublane-aligned adds, lands in (B*L, E)
    attn = ctx[0:BL] + ctx[BL:2 * BL] + ctx[2 * BL:3 * BL] + ctx[3 * BL:4 * BL]
    attn = _mm(attn, ld("wo")) + ld("bo")
    h = _layernorm(h + attn, ld("g1"), ld("be1"))

    f = jnp.maximum(_mm(h, ld("wf1")) + ld("bf1"), 0.0)   # relu, (B*L, FF)
    f = _dot_bt(f, ld("wf2T")) + ld("bf2")                # lane-dense wf2T
    h = _layernorm(h + f, ld("g2"), ld("be2"))            # (B*L, E)

    # ---- BridgeLayer('sum') + first mlp1 Linear hoisted through the sum ----
    #   (h[i]+h[j]) @ w1a + b1a == u[i] + u[j] + b1a,  u = h @ w1a
    # realized as ONE selection matmul: act = leaky(Rsum @ u + b1a)
    u = _mm(h, ld("w1a"))                                 # (B*L, H1)
    act = _leaky(_mm(ld("rsum"), u) + ld("b1a"))          # (B*L*L, H1)

    # final Linear computed transposed + padded to 8 sublanes ->
    # one full (8,128) vreg store (rows 4..7 are zero weights/bias).
    out_ref[...] = _dot_bt(ld("w1bT"), act) + ld("b1bc")  # (OUT_ROWS, B*L*L)


def bb_transformer_forward(x_lbc, slab):
    """x_lbc: (L, B, C_IN) f32 -> (B, NUM_CLASSES, L, L) f32."""
    x_flat = jnp.transpose(x_lbc, (1, 0, 2)).reshape(BL, C_IN)

    yT = pl.pallas_call(
        _kernel,
        out_shape=jax.ShapeDtypeStruct((OUT_ROWS, BLL), jnp.float32),
        grid=(1,),
        in_specs=[
            pl.BlockSpec((BL, C_IN), lambda i: (0, 0)),
            pl.BlockSpec((SLAB_ROWS, SLAB_LANES), lambda i: (0, 0)),
        ],
        out_specs=pl.BlockSpec((OUT_ROWS, BLL), lambda i: (0, 0)),
        compiler_params=pltpu.CompilerParams(
            dimension_semantics=("arbitrary",)),   # single step, single core
    )(x_flat, slab)

    # glue: (c, b*l*l) -> (b, c, l, l).  Output is already exactly symmetric
    # in (l, l) for the 'sum' bridge, so the module's (y + y^T)/2 is a no-op.
    y = yT[:NUM_CLASSES].reshape(NUM_CLASSES, B, L, L)
    return jnp.transpose(y, (1, 0, 2, 3))


# --------------------------- reference (pure JAX) ---------------------------
def _reference_single(xb, params):
    """Unfused per-sample forward (mirrors the PyTorch module literally)."""
    (w0a, b0a, w0b, b0b,
     wq, bq, wk, bk, wv, bv, wo, bo,
     g1, be1, wf1, bf1, wf2, bf2, g2, be2,
     w1a, b1a, w1b, b1b) = params

    h = _leaky(_mm(xb, w0a) + b0a)
    h = _mm(h, w0b) + b0b
    h = _leaky(h)

    q = _mm(h, wq) + bq
    k = _mm(h, wk) + bk
    v = _mm(h, wv) + bv
    scale = 1.0 / (HEAD_DIM ** 0.5)
    head_outs = []
    for hh in range(NHEAD):
        lo = hh * HEAD_DIM
        qh, kh, vh = q[:, lo:lo + HEAD_DIM], k[:, lo:lo + HEAD_DIM], v[:, lo:lo + HEAD_DIM]
        s = _dot_bt(qh, kh) * scale
        s = s - jnp.max(s, axis=-1, keepdims=True)
        p = jnp.exp(s)
        p = p / jnp.sum(p, axis=-1, keepdims=True)
        head_outs.append(_mm(p, vh))
    attn = jnp.concatenate(head_outs, axis=-1)
    attn = _mm(attn, wo) + bo
    h = _layernorm(h + attn, g1, be1)

    f = jnp.maximum(_mm(h, wf1) + bf1, 0.0)
    f = _mm(f, wf2) + bf2
    h = _layernorm(h + f, g2, be2)

    hi = lax.broadcast_in_dim(h, (L, L, E), (0, 2))
    hj = lax.broadcast_in_dim(h, (L, L, E), (1, 2))
    bridged = (hi + hj).reshape(L * L, E)

    y = _leaky(_mm(bridged, w1a) + b1a)
    y = _mm(y, w1b) + b1b
    return y


def reference_forward(x_lbc, params):
    x_blc = jnp.transpose(x_lbc, (1, 0, 2))
    y = jax.vmap(lambda xb: _reference_single(xb, params))(x_blc)
    y = y.reshape(B, L, L, NUM_CLASSES)
    y = jnp.transpose(y, (0, 3, 1, 2))
    return (y + jnp.swapaxes(y, 2, 3)) * 0.5   # identity here, kept for fidelity


# ------------------------------ parameter init ------------------------------
def _linear(key, fan_in, fan_out):
    kw, kb = jax.random.split(key)
    bound = 1.0 / (fan_in ** 0.5)
    w = jax.random.uniform(kw, (fan_in, fan_out), jnp.float32, -bound, bound)
    b = jax.random.uniform(kb, (1, fan_out), jnp.float32, -bound, bound)
    return w, b


def init_params(key):
    ks = jax.random.split(key, 10)
    w0a, b0a = _linear(ks[0], C_IN, E)
    w0b, b0b = _linear(ks[1], E, E)
    wq, bq = _linear(ks[2], E, E)
    wk, bk = _linear(ks[3], E, E)
    wv, bv = _linear(ks[4], E, E)
    wo, bo = _linear(ks[5], E, E)
    g1 = jnp.ones((1, E), jnp.float32)
    be1 = jnp.zeros((1, E), jnp.float32)
    wf1, bf1 = _linear(ks[6], E, FF)
    wf2, bf2 = _linear(ks[7], FF, E)
    g2 = jnp.ones((1, E), jnp.float32)
    be2 = jnp.zeros((1, E), jnp.float32)
    w1a, b1a = _linear(ks[8], E, H1)
    w1b, b1b = _linear(ks[9], H1, NUM_CLASSES)
    return (w0a, b0a, w0b, b0b, wq, bq, wk, bk, wv, bv, wo, bo,
            g1, be1, wf1, bf1, wf2, bf2, g2, be2, w1a, b1a, w1b, b1b)


# ----------------------------------- main ------------------------------------
if __name__ == "__main__":
    key = jax.random.PRNGKey(0)
    kx, kp = jax.random.split(key)
    params = init_params(kp)
    x = jax.random.normal(kx, (L, B, C_IN), jnp.float32)   # (l, b, c) like PyTorch

    slab = pack_params(params)                              # one lane-dense slab

    out = jax.jit(bb_transformer_forward)(x, slab)
    out = jax.block_until_ready(out)

    ref = reference_forward(x, params)
    assert out.shape == (B, NUM_CLASSES, L, L)
    assert bool(jnp.all(jnp.isfinite(out)))
    assert bool(jnp.allclose(out, ref, atol=1e-2, rtol=1e-2))
    print("KERNEL_OK")
</pallas_src>

<mosaic_0001>
module attributes {stable_mosaic.version = 11 : i64} {
  func.func @_kernel(%arg0: i32, %arg1: memref<16x4xf32, #tpu.memory_space<vmem>>, %arg2: memref<416x128xf32, #tpu.memory_space<vmem>>, %arg3: memref<8x128xf32, #tpu.memory_space<vmem>>) attributes {dimension_semantics = [#tpu.dimension_semantics<arbitrary>], iteration_bounds = array<i64: 1>, scalar_prefetch = 0 : i64, scratch_operands = 0 : i64, tpu.core_type = #tpu.core_type<tc>, window_params = [{pipeline_mode = #tpu.pipeline_mode<synchronous>, transform_indices = @transform_0, window_bounds = array<i64: 16, 4>}, {pipeline_mode = #tpu.pipeline_mode<synchronous>, transform_indices = @transform_1, window_bounds = array<i64: 416, 128>}, {pipeline_mode = #tpu.pipeline_mode<synchronous>, transform_indices = @transform_2, window_bounds = array<i64: 8, 128>}]} {
    %c0 = arith.constant 0 : index
    %c0_0 = arith.constant 0 : index
    %0 = vector.load %arg1[%c0, %c0_0] : memref<16x4xf32, #tpu.memory_space<vmem>>, vector<16x4xf32>
    %c0_1 = arith.constant 0 : index
    %c0_2 = arith.constant 0 : index
    %1 = vector.load %arg2[%c0_1, %c0_2] : memref<416x128xf32, #tpu.memory_space<vmem>>, vector<4x8xf32>
    %cst = arith.constant dense<0.000000e+00> : vector<16x8xf32>
    %2 = tpu.matmul %0, %1, %cst {dimension_numbers = #tpu.dot_dimension_numbers<[1], [0], [0], [1], [0, 0, 1, 1], [], []>} : vector<16x4xf32>, vector<4x8xf32>, vector<16x8xf32> -> vector<16x8xf32>
    %c8 = arith.constant 8 : index
    %c0_3 = arith.constant 0 : index
    %3 = vector.load %arg2[%c8, %c0_3] : memref<416x128xf32, #tpu.memory_space<vmem>>, vector<1x8xf32>
    %4 = vector.broadcast %3 : vector<1x8xf32> to vector<16x8xf32>
    %5 = arith.addf %2, %4 : vector<16x8xf32>
    %cst_4 = arith.constant 0.000000e+00 : f32
    %6 = vector.broadcast %cst_4 : f32 to vector<16x8xf32>
    %7 = arith.cmpf oge, %5, %6 : vector<16x8xf32>
    %cst_5 = arith.constant 1.000000e-01 : f32
    %8 = vector.broadcast %cst_5 : f32 to vector<16x8xf32>
    %9 = arith.mulf %8, %5 : vector<16x8xf32>
    %10 = arith.select %7, %5, %9 : vector<16x8xi1>, vector<16x8xf32>
    %c16 = arith.constant 16 : index
    %c0_6 = arith.constant 0 : index
    %11 = vector.load %arg2[%c16, %c0_6] : memref<416x128xf32, #tpu.memory_space<vmem>>, vector<8x8xf32>
    %cst_7 = arith.constant dense<0.000000e+00> : vector<16x8xf32>
    %12 = tpu.matmul %10, %11, %cst_7 {dimension_numbers = #tpu.dot_dimension_numbers<[1], [0], [0], [1], [0, 0, 1, 1], [], []>} : vector<16x8xf32>, vector<8x8xf32>, vector<16x8xf32> -> vector<16x8xf32>
    %c24 = arith.constant 24 : index
    %c0_8 = arith.constant 0 : index
    %13 = vector.load %arg2[%c24, %c0_8] : memref<416x128xf32, #tpu.memory_space<vmem>>, vector<1x8xf32>
    %14 = vector.broadcast %13 : vector<1x8xf32> to vector<16x8xf32>
    %15 = arith.addf %12, %14 : vector<16x8xf32>
    %cst_9 = arith.constant 0.000000e+00 : f32
    %16 = vector.broadcast %cst_9 : f32 to vector<16x8xf32>
    %17 = arith.cmpf oge, %15, %16 : vector<16x8xf32>
    %cst_10 = arith.constant 1.000000e-01 : f32
    %18 = vector.broadcast %cst_10 : f32 to vector<16x8xf32>
    %19 = arith.mulf %18, %15 : vector<16x8xf32>
    %20 = arith.select %17, %15, %19 : vector<16x8xi1>, vector<16x8xf32>
    %c32 = arith.constant 32 : index
    %c0_11 = arith.constant 0 : index
    %21 = vector.load %arg2[%c32, %c0_11] : memref<416x128xf32, #tpu.memory_space<vmem>>, vector<8x24xf32>
    %cst_12 = arith.constant dense<0.000000e+00> : vector<16x24xf32>
    %22 = tpu.matmul %20, %21, %cst_12 {dimension_numbers = #tpu.dot_dimension_numbers<[1], [0], [0], [1], [0, 0, 1, 1], [], []>} : vector<16x8xf32>, vector<8x24xf32>, vector<16x24xf32> -> vector<16x24xf32>
    %c40 = arith.constant 40 : index
    %c0_13 = arith.constant 0 : index
    %23 = vector.load %arg2[%c40, %c0_13] : memref<416x128xf32, #tpu.memory_space<vmem>>, vector<1x24xf32>
    %24 = vector.broadcast %23 : vector<1x24xf32> to vector<16x24xf32>
    %25 = arith.addf %22, %24 : vector<16x24xf32>
    %26 = vector.extract_strided_slice %25 {offsets = [0, 0], sizes = [16, 8], strides = [1, 1]} : vector<16x24xf32> to vector<16x8xf32>
    %27 = vector.extract_strided_slice %25 {offsets = [0, 8], sizes = [16, 8], strides = [1, 1]} : vector<16x24xf32> to vector<16x8xf32>
    %28 = vector.extract_strided_slice %25 {offsets = [0, 16], sizes = [16, 8], strides = [1, 1]} : vector<16x24xf32> to vector<16x8xf32>
    %c160 = arith.constant 160 : index
    %c0_14 = arith.constant 0 : index
    %29 = vector.load %arg2[%c160, %c0_14] : memref<416x128xf32, #tpu.memory_space<vmem>>, vector<64x8xf32>
    %c224 = arith.constant 224 : index
    %c0_15 = arith.constant 0 : index
    %30 = vector.load %arg2[%c224, %c0_15] : memref<416x128xf32, #tpu.memory_space<vmem>>, vector<64x16xf32>
    %31 = tpu.concatenate %26, %26, %26, %26 in 0 : vector<16x8xf32>, vector<16x8xf32>, vector<16x8xf32>, vector<16x8xf32> -> vector<64x8xf32>
    %32 = arith.mulf %31, %29 : vector<64x8xf32>
    %cst_16 = arith.constant dense<0.000000e+00> : vector<64x16xf32>
    %33 = tpu.matmul %32, %27, %cst_16 {dimension_numbers = #tpu.dot_dimension_numbers<[1], [1], [0], [0], [0, 0, 1, 0], [], []>} : vector<64x8xf32>, vector<16x8xf32>, vector<64x16xf32> -> vector<64x16xf32>
    %cst_17 = arith.constant 0.707106769 : f32
    %34 = vector.broadcast %cst_17 : f32 to vector<64x16xf32>
    %35 = arith.mulf %33, %34 : vector<64x16xf32>
    %36 = arith.addf %35, %30 : vector<64x16xf32>
    %cst_18 = arith.constant dense<0xFF800000> : vector<64xf32>
    %37 = vector.multi_reduction <maximumf>, %36, %cst_18 [1] : vector<64x16xf32> to vector<64xf32>
    %38 = vector.shape_cast %37 : vector<64xf32> to vector<64x1xf32>
    %39 = vector.broadcast %38 : vector<64x1xf32> to vector<64x16xf32>
    %40 = arith.subf %36, %39 : vector<64x16xf32>
    %41 = math.exp %40 : vector<64x16xf32>
    %cst_19 = arith.constant dense<0.000000e+00> : vector<64xf32>
    %42 = vector.multi_reduction <add>, %41, %cst_19 [1] : vector<64x16xf32> to vector<64xf32>
    %43 = vector.shape_cast %42 : vector<64xf32> to vector<64x1xf32>
    %44 = tpu.reciprocal %43 {approx = true} : vector<64x1xf32> -> vector<64x1xf32>
    %45 = vector.broadcast %44 : vector<64x1xf32> to vector<64x16xf32>
    %46 = arith.mulf %41, %45 : vector<64x16xf32>
    %cst_20 = arith.constant dense<0.000000e+00> : vector<64x8xf32>
    %47 = tpu.matmul %46, %28, %cst_20 {dimension_numbers = #tpu.dot_dimension_numbers<[1], [0], [0], [1], [0, 0, 1, 1], [], []>} : vector<64x16xf32>, vector<16x8xf32>, vector<64x8xf32> -> vector<64x8xf32>
    %48 = arith.mulf %47, %29 : vector<64x8xf32>
    %49 = vector.extract_strided_slice %48 {offsets = [0, 0], sizes = [16, 8], strides = [1, 1]} : vector<64x8xf32> to vector<16x8xf32>
    %50 = vector.extract_strided_slice %48 {offsets = [16, 0], sizes = [16, 8], strides = [1, 1]} : vector<64x8xf32> to vector<16x8xf32>
    %51 = arith.addf %49, %50 : vector<16x8xf32>
    %52 = vector.extract_strided_slice %48 {offsets = [32, 0], sizes = [16, 8], strides = [1, 1]} : vector<64x8xf32> to vector<16x8xf32>
    %53 = arith.addf %51, %52 : vector<16x8xf32>
    %54 = vector.extract_strided_slice %48 {offsets = [48, 0], sizes = [16, 8], strides = [1, 1]} : vector<64x8xf32> to vector<16x8xf32>
    %55 = arith.addf %53, %54 : vector<16x8xf32>
    %c48 = arith.constant 48 : index
    %c0_21 = arith.constant 0 : index
    %56 = vector.load %arg2[%c48, %c0_21] : memref<416x128xf32, #tpu.memory_space<vmem>>, vector<8x8xf32>
    %cst_22 = arith.constant dense<0.000000e+00> : vector<16x8xf32>
    %57 = tpu.matmul %55, %56, %cst_22 {dimension_numbers = #tpu.dot_dimension_numbers<[1], [0], [0], [1], [0, 0, 1, 1], [], []>} : vector<16x8xf32>, vector<8x8xf32>, vector<16x8xf32> -> vector<16x8xf32>
    %c56 = arith.constant 56 : index
    %c0_23 = arith.constant 0 : index
    %58 = vector.load %arg2[%c56, %c0_23] : memref<416x128xf32, #tpu.memory_space<vmem>>, vector<1x8xf32>
    %59 = vector.broadcast %58 : vector<1x8xf32> to vector<16x8xf32>
    %60 = arith.addf %57, %59 : vector<16x8xf32>
    %61 = arith.addf %20, %60 : vector<16x8xf32>
    %c64 = arith.constant 64 : index
    %c0_24 = arith.constant 0 : index
    %62 = vector.load %arg2[%c64, %c0_24] : memref<416x128xf32, #tpu.memory_space<vmem>>, vector<1x8xf32>
    %c72 = arith.constant 72 : index
    %c0_25 = arith.constant 0 : index
    %63 = vector.load %arg2[%c72, %c0_25] : memref<416x128xf32, #tpu.memory_space<vmem>>, vector<1x8xf32>
    %cst_26 = arith.constant dense<0.000000e+00> : vector<16xf32>
    %64 = vector.multi_reduction <add>, %61, %cst_26 [1] : vector<16x8xf32> to vector<16xf32>
    %65 = vector.shape_cast %64 : vector<16xf32> to vector<16x1xf32>
    %cst_27 = arith.constant 8.000000e+00 : f32
    %66 = vector.broadcast %cst_27 : f32 to vector<16x1xf32>
    %67 = arith.divf %65, %66 : vector<16x1xf32>
    %68 = vector.broadcast %67 : vector<16x1xf32> to vector<16x8xf32>
    %69 = arith.subf %61, %68 : vector<16x8xf32>
    %70 = arith.mulf %69, %69 : vector<16x8xf32>
    %cst_28 = arith.constant dense<0.000000e+00> : vector<16xf32>
    %71 = vector.multi_reduction <add>, %70, %cst_28 [1] : vector<16x8xf32> to vector<16xf32>
    %72 = vector.shape_cast %71 : vector<16xf32> to vector<16x1xf32>
    %cst_29 = arith.constant 8.000000e+00 : f32
    %73 = vector.broadcast %cst_29 : f32 to vector<16x1xf32>
    %74 = arith.divf %72, %73 : vector<16x1xf32>
    %75 = vector.broadcast %67 : vector<16x1xf32> to vector<16x8xf32>
    %76 = arith.subf %61, %75 : vector<16x8xf32>
    %cst_30 = arith.constant 9.99999974E-6 : f32
    %77 = vector.broadcast %cst_30 : f32 to vector<16x1xf32>
    %78 = arith.addf %74, %77 : vector<16x1xf32>
    %79 = math.rsqrt %78 : vector<16x1xf32>
    %80 = vector.broadcast %79 : vector<16x1xf32> to vector<16x8xf32>
    %81 = arith.mulf %76, %80 : vector<16x8xf32>
    %82 = vector.broadcast %62 : vector<1x8xf32> to vector<16x8xf32>
    %83 = arith.mulf %81, %82 : vector<16x8xf32>
    %84 = vector.broadcast %63 : vector<1x8xf32> to vector<16x8xf32>
    %85 = arith.addf %83, %84 : vector<16x8xf32>
    %c80 = arith.constant 80 : index
    %c0_31 = arith.constant 0 : index
    %86 = vector.load %arg2[%c80, %c0_31] : memref<416x128xf32, #tpu.memory_space<vmem>>, vector<8x128xf32>
    %cst_32 = arith.constant dense<0.000000e+00> : vector<16x128xf32>
    %87 = tpu.matmul %85, %86, %cst_32 {dimension_numbers = #tpu.dot_dimension_numbers<[1], [0], [0], [1], [0, 0, 1, 1], [], []>} : vector<16x8xf32>, vector<8x128xf32>, vector<16x128xf32> -> vector<16x128xf32>
    %c88 = arith.constant 88 : index
    %c0_33 = arith.constant 0 : index
    %88 = vector.load %arg2[%c88, %c0_33] : memref<416x128xf32, #tpu.memory_space<vmem>>, vector<1x128xf32>
    %89 = vector.broadcast %88 : vector<1x128xf32> to vector<16x128xf32>
    %90 = arith.addf %87, %89 : vector<16x128xf32>
    %cst_34 = arith.constant 0.000000e+00 : f32
    %91 = vector.broadcast %cst_34 : f32 to vector<16x128xf32>
    %92 = arith.maximumf %90, %91 : vector<16x128xf32>
    %c96 = arith.constant 96 : index
    %c0_35 = arith.constant 0 : index
    %93 = vector.load %arg2[%c96, %c0_35] : memref<416x128xf32, #tpu.memory_space<vmem>>, vector<8x128xf32>
    %cst_36 = arith.constant dense<0.000000e+00> : vector<16x8xf32>
    %94 = tpu.matmul %92, %93, %cst_36 {dimension_numbers = #tpu.dot_dimension_numbers<[1], [1], [0], [0], [0, 0, 1, 0], [], []>} : vector<16x128xf32>, vector<8x128xf32>, vector<16x8xf32> -> vector<16x8xf32>
    %c104 = arith.constant 104 : index
    %c0_37 = arith.constant 0 : index
    %95 = vector.load %arg2[%c104, %c0_37] : memref<416x128xf32, #tpu.memory_space<vmem>>, vector<1x8xf32>
    %96 = vector.broadcast %95 : vector<1x8xf32> to vector<16x8xf32>
    %97 = arith.addf %94, %96 : vector<16x8xf32>
    %98 = arith.addf %85, %97 : vector<16x8xf32>
    %c112 = arith.constant 112 : index
    %c0_38 = arith.constant 0 : index
    %99 = vector.load %arg2[%c112, %c0_38] : memref<416x128xf32, #tpu.memory_space<vmem>>, vector<1x8xf32>
    %c120 = arith.constant 120 : index
    %c0_39 = arith.constant 0 : index
    %100 = vector.load %arg2[%c120, %c0_39] : memref<416x128xf32, #tpu.memory_space<vmem>>, vector<1x8xf32>
    %cst_40 = arith.constant dense<0.000000e+00> : vector<16xf32>
    %101 = vector.multi_reduction <add>, %98, %cst_40 [1] : vector<16x8xf32> to vector<16xf32>
    %102 = vector.shape_cast %101 : vector<16xf32> to vector<16x1xf32>
    %cst_41 = arith.constant 8.000000e+00 : f32
    %103 = vector.broadcast %cst_41 : f32 to vector<16x1xf32>
    %104 = arith.divf %102, %103 : vector<16x1xf32>
    %105 = vector.broadcast %104 : vector<16x1xf32> to vector<16x8xf32>
    %106 = arith.subf %98, %105 : vector<16x8xf32>
    %107 = arith.mulf %106, %106 : vector<16x8xf32>
    %cst_42 = arith.constant dense<0.000000e+00> : vector<16xf32>
    %108 = vector.multi_reduction <add>, %107, %cst_42 [1] : vector<16x8xf32> to vector<16xf32>
    %109 = vector.shape_cast %108 : vector<16xf32> to vector<16x1xf32>
    %cst_43 = arith.constant 8.000000e+00 : f32
    %110 = vector.broadcast %cst_43 : f32 to vector<16x1xf32>
    %111 = arith.divf %109, %110 : vector<16x1xf32>
    %112 = vector.broadcast %104 : vector<16x1xf32> to vector<16x8xf32>
    %113 = arith.subf %98, %112 : vector<16x8xf32>
    %cst_44 = arith.constant 9.99999974E-6 : f32
    %114 = vector.broadcast %cst_44 : f32 to vector<16x1xf32>
    %115 = arith.addf %111, %114 : vector<16x1xf32>
    %116 = math.rsqrt %115 : vector<16x1xf32>
    %117 = vector.broadcast %116 : vector<16x1xf32> to vector<16x8xf32>
    %118 = arith.mulf %113, %117 : vector<16x8xf32>
    %119 = vector.broadcast %99 : vector<1x8xf32> to vector<16x8xf32>
    %120 = arith.mulf %118, %119 : vector<16x8xf32>
    %121 = vector.broadcast %100 : vector<1x8xf32> to vector<16x8xf32>
    %122 = arith.addf %120, %121 : vector<16x8xf32>
    %c128 = arith.constant 128 : index
    %c0_45 = arith.constant 0 : index
    %123 = vector.load %arg2[%c128, %c0_45] : memref<416x128xf32, #tpu.memory_space<vmem>>, vector<8x64xf32>
    %cst_46 = arith.constant dense<0.000000e+00> : vector<16x64xf32>
    %124 = tpu.matmul %122, %123, %cst_46 {dimension_numbers = #tpu.dot_dimension_numbers<[1], [0], [0], [1], [0, 0, 1, 1], [], []>} : vector<16x8xf32>, vector<8x64xf32>, vector<16x64xf32> -> vector<16x64xf32>
    %c288 = arith.constant 288 : index
    %c0_47 = arith.constant 0 : index
    %125 = vector.load %arg2[%c288, %c0_47] : memref<416x128xf32, #tpu.memory_space<vmem>>, vector<128x16xf32>
    %cst_48 = arith.constant dense<0.000000e+00> : vector<128x64xf32>
    %126 = tpu.matmul %125, %124, %cst_48 {dimension_numbers = #tpu.dot_dimension_numbers<[1], [0], [0], [1], [0, 0, 1, 1], [], []>} : vector<128x16xf32>, vector<16x64xf32>, vector<128x64xf32> -> vector<128x64xf32>
    %c136 = arith.constant 136 : index
    %c0_49 = arith.constant 0 : index
    %127 = vector.load %arg2[%c136, %c0_49] : memref<416x128xf32, #tpu.memory_space<vmem>>, vector<1x64xf32>
    %128 = vector.broadcast %127 : vector<1x64xf32> to vector<128x64xf32>
    %129 = arith.addf %126, %128 : vector<128x64xf32>
    %cst_50 = arith.constant 0.000000e+00 : f32
    %130 = vector.broadcast %cst_50 : f32 to vector<128x64xf32>
    %131 = arith.cmpf oge, %129, %130 : vector<128x64xf32>
    %cst_51 = arith.constant 1.000000e-01 : f32
    %132 = vector.broadcast %cst_51 : f32 to vector<128x64xf32>
    %133 = arith.mulf %132, %129 : vector<128x64xf32>
    %134 = arith.select %131, %129, %133 : vector<128x64xi1>, vector<128x64xf32>
    %c144 = arith.constant 144 : index
    %c0_52 = arith.constant 0 : index
    %135 = vector.load %arg2[%c144, %c0_52] : memref<416x128xf32, #tpu.memory_space<vmem>>, vector<8x64xf32>
    %cst_53 = arith.constant dense<0.000000e+00> : vector<8x128xf32>
    %136 = tpu.matmul %135, %134, %cst_53 {dimension_numbers = #tpu.dot_dimension_numbers<[1], [1], [0], [0], [0, 0, 1, 0], [], []>} : vector<8x64xf32>, vector<128x64xf32>, vector<8x128xf32> -> vector<8x128xf32>
    %c152 = arith.constant 152 : index
    %c0_54 = arith.constant 0 : index
    %137 = vector.load %arg2[%c152, %c0_54] : memref<416x128xf32, #tpu.memory_space<vmem>>, vector<8x1xf32>
    %138 = vector.broadcast %137 : vector<8x1xf32> to vector<8x128xf32>
    %139 = arith.addf %136, %138 : vector<8x128xf32>
    %c0_55 = arith.constant 0 : index
    %c0_56 = arith.constant 0 : index
    %140 = vector.load %arg3[%c0_55, %c0_56] : memref<8x128xf32, #tpu.memory_space<vmem>>, vector<8x128xf32>
    tpu.vector_store %arg3[%c0_55, %c0_56], %139 {strides = array<i32>} : memref<8x128xf32, #tpu.memory_space<vmem>>, vector<8x128xf32>,
    return
  }
  func.func @transform_0(%arg0: i32) -> (i32, i32) {
    %c0_i32 = arith.constant 0 : i32
    %c0_i32_0 = arith.constant 0 : i32
    %c0_i32_1 = arith.constant 0 : i32
    return %c0_i32, %c0_i32_0 : i32, i32
  }
  func.func @transform_1(%arg0: i32) -> (i32, i32) {
    %c0_i32 = arith.constant 0 : i32
    %c0_i32_0 = arith.constant 0 : i32
    %c0_i32_1 = arith.constant 0 : i32
    return %c0_i32, %c0_i32_0 : i32, i32
  }
  func.func @transform_2(%arg0: i32) -> (i32, i32) {
    %c0_i32 = arith.constant 0 : i32
    %c0_i32_0 = arith.constant 0 : i32
    %c0_i32_1 = arith.constant 0 : i32
    return %c0_i32, %c0_i32_0 : i32, i32
  }
}

</mosaic_0001>

<bundles_post_ra>
// kernel: bb_transformer_forward.1
= control target key start
LH: loop header
LB: loop body
LE: loop exit
PB: predicated region body
PF: predicated region fallthrough
CT: control target
= control target key end

     0   :  { %7 = vsyncpa [#allocation3], 0  ;;  %s1956_s9 = smov [#allocation2]   ;;  %s2162_s0 = inlined_call_operand.vmem [shape: f32[16,4], index: 0, kind: input, shape index: {}]   ;;  %s2163_s1 = inlined_call_operand.hbm [shape: f32[416,128], index: 1, kind: input, shape index: {}]   ;;  %s2164_s2 = inlined_call_operand.vmem [shape: f32[8,128], index: 2, kind: output, shape index: {}]  }
   0x1   :  { %s15_s10 = sshll.u32 %s1956_s9, 4  ;;  %s1932_s13 = scalar_lea.hbm %s2163_s1, 6656  ;;  %s16_s10 = int_to_ptr.vmem [resolvable:$true] %s15_s10 }
   0x2   :  { %p1933_p0 = scmp.ne.s32.totalorder %s2163_s1, %s1932_s13  ;;  %p1936_p1 = scmp.lt.u32.totalorder %s1932_s13, %s2163_s1 }
   0x4   :  { %p1938_p2 = pnand %p1936_p1, %p1933_p0 }
   0x6   :  { %1941 = shalt.err (!%p1938_p2)
}
   0x7   :  { %s1942_s18 = scalar_lea.vmem %s16_s10, 6656  ;;  %p1947_p4 = scmp.lt.s32.totalorder %s16_s10, %s16_s10 }
   0x8   :  { %p1943_p3 = scmp.ne.s32.totalorder %s16_s10, %s1942_s18  ;;  %p1948_p5 = scmp.lt.s32.totalorder %s1942_s18, %s1942_s18 }
   0xa   :  { %p1949_p6 = por %p1948_p5, %p1947_p4 }
   0xc   :  { %p1950_p7 = pnand %p1949_p6, %p1943_p3 }
   0xe   :  { %1953 = shalt.err (!%p1950_p7)
}
   0xf   :  { %s1957_s19 = smov 128   ;;  %s1958_s20 = smov 8  }
  0x10   :  { %21 = dma.hbm_to_vmem [thread:$0]  %s2163_s1, 6656, %s16_s10, [#allocation3], %s1957_s19, %s1957_s19, %s1958_s20  }
  0x11   :  { %1954 = dma.done.wait [#allocation3], 6656  }
  0x12   :  { %1955 = vsyncadd [#allocation3], 4294960640  ;;  %vm40_vm0 = vcmask 1043456   ;;  %vm33_vm1 = vcmask 31744   ;;  %v27_v0 = vld [vmem:[#allocation2] sm:$0xf] }
  0x13   :  { %v25_v1 = vld [vmem:[%s2162_s0] sm:$0xff]  ;;  %v26_v2 = vld [vmem:[%s2162_s0 + $0x8] sm:$0xff]  ;;  %1695 = vmatprep.subr.msk.mxu1 %vm40_vm0, %v27_v0  ;;  %v125_v3 = vld [vmem:[#allocation2 + $0x10] sm:$0xff]  ;;  %vm131_vm4 = vcmask 64512   ;;  %s1959_s0 = smov 120   ;;  %vm485_vm8 = vcmask 130048  }
  0x14   :  { %1697 = vmatprep.mubr.msk.f32.mxu1 %vm33_vm1, %v25_v1  ;;  %1696 = vmatpush3.msk.msra.mxu1 %vm40_vm0, %v27_v0  ;;  %v1544_v4 = vld [vmem:[#allocation2 + $0x8] ss:$0 sm:$0xff]  ;;  %v219_v13 = vld [vmem:[#allocation2 + $0x20] sm:$0xff]  ;;  %v1548_v14 = vld [vmem:[#allocation2 + $0x18] ss:$0 sm:$0xff]  ;;  %s1960_s1 = smov 112  }
  0x15   :  { %1698 = vmatmul.mubr.msk.f32.vlgmr.msra.gmra.mrb[0].mxu1 %vm33_vm1, %v26_v2  ;;  %1700 = vmatprep.subr.mxu1 %v125_v3  ;;  %v1551_v23 = vld [vmem:[#allocation2 + $0x28] ss:$0 sm:$0xff]  ;;  %v2008_v27 = vld [vmem:[#allocation2 + $0xa0] sm:$0xff]  ;;  %vm1826_vm7 = vmpackc.low %vm131_vm4, %vm131_vm4  ;;  %vm1962_vm9 = vmmov 0   ;;  %vm1416_vm11 = vcmask 523264  }
  0x16   :  { %1701 = vmatpush3.msra.mxu1 %v125_v3  ;;  %1705 = vmatprep.subr.mxu0 %v219_v13  ;;  %v2017_v35 = vld [vmem:[#allocation2 + $0xa8] sm:$0xff]  ;;  %v2019_v36 = vld [vmem:[#allocation2 + $0xb0] sm:$0xff]  ;;  %v2023_v39 = vld [vmem:[#allocation2 + $0xb8] sm:$0xff] }
  0x17   :  { %1706 = vmatpush3.msra.mxu0 %v219_v13  ;;  %v2026_v40 = vld [vmem:[#allocation2 + $0xc0] sm:$0xff]  ;;  %v2031_v43 = vld [vmem:[#allocation2 + $0xc8] sm:$0xff]  ;;  %v2034_v44 = vld [vmem:[#allocation2 + $0xd0] sm:$0xff] }
  0x18   :  { %v2039_v47 = vld [vmem:[#allocation2 + $0xd8] sm:$0xff]  ;;  %v315_v50 = vld [vmem:[#allocation2 + $0xe8] sm:$0xff]  ;;  %v314_v53 = vld [vmem:[#allocation2 + $0xe0] sm:$0xff] }
  0x19   :  { %v317_v58 = vld [vmem:[#allocation2 + $0xf8] sm:$0xff]  ;;  %v316_v0 = vld [vmem:[#allocation2 + $0xf0] sm:$0xff]  ;;  %v318_v13 = vld [vmem:[#allocation2 + $0x100] sm:$0xff] }
  0x1a   :  { %vm2119_vm13 = vmpackc.low %vm1416_vm11, %vm1416_vm11 }
  0xe8   :  { %v1699_v5 = vpop.f32.mrb[0].mxu1 }
  0xe9   :  { %v116_v6 = vadd.f32 %v1699_v5, %v1544_v4  ;;  %v110_v7 = vpop.f32.mrb[1].mxu1 }
  0xea   :  { %v111_v8 = vadd.f32 %v1544_v4, %v110_v7  ;;  %v319_v7 = vld [vmem:[#allocation2 + $0x108] sm:$0xff] }
  0xeb   :  { %v122_v9 = vmul.f32 0.1, %v116_v6  ;;  %vm120_vm2 = vcmp.ge.f32.partialorder %v116_v6, 0.0 }
  0xec   :  { %vm119_vm3 = vcmp.ge.f32.partialorder %v111_v8, 0.0  ;;  %v121_v10 = vmul.f32 0.1, %v111_v8 }
  0xed   :  { %v124_v12 = vsel %vm120_vm2, %v116_v6, %v122_v9 }
  0xee   :  { %v123_v11 = vsel %vm119_vm3, %v111_v8, %v121_v10 }
  0xef   :  { %1702 = vmatprep.mubr.msk.f32.mxu1 %vm131_vm4, %v123_v11 }
  0xf0   :  { %1703 = vmatmul.mubr.msk.f32.vlgmr.msra.gmra.mrb[2].mxu1 %vm131_vm4, %v124_v12 }
 0x1c3   :  { %v1704_v15 = vpop.f32.mrb[2].mxu1 }
 0x1c4   :  { %v210_v16 = vadd.f32 %v1704_v15, %v1548_v14  ;;  %v204_v17 = vpop.f32.mrb[3].mxu1 }
 0x1c5   :  { %v205_v18 = vadd.f32 %v1548_v14, %v204_v17  ;;  %v320_v17 = vld [vmem:[#allocation2 + $0x110] sm:$0xff] }
 0x1c6   :  { %v216_v19 = vmul.f32 0.1, %v210_v16  ;;  %vm214_vm5 = vcmp.ge.f32.partialorder %v210_v16, 0.0 }
 0x1c7   :  { %vm213_vm6 = vcmp.ge.f32.partialorder %v205_v18, 0.0  ;;  %v215_v20 = vmul.f32 0.1, %v205_v18 }
 0x1c8   :  { %v2004_v22 = vsel %vm214_vm5, %v210_v16, %v216_v19 }
 0x1c9   :  { %v2000_v21 = vsel %vm213_vm6, %v205_v18, %v215_v20 }
 0x1ca   :  { %1707 = vmatprep.mubr.msk.f32.mxu0 %vm131_vm4, %v2000_v21 }
 0x1cb   :  { %1708 = vmatmul.mubr.msk.f32.vlgmr.msra.gmra.mrb[0].mxu0 %vm131_vm4, %v2004_v22 }
 0x29e   :  { %v1709_v24 = vpop.f32.mrb[0].mxu0 }
 0x29f   :  { %v303_v25 = vadd.f32 %v1709_v24, %v1551_v23  ;;  %v297_v26 = vpop.f32.mrb[1].mxu0 }
 0x2a0   :  { %v298_v28 = vadd.f32 %v1551_v23, %v297_v26  ;;  %v321_v23 = vld [vmem:[#allocation2 + $0x118] sm:$0xff] }
 0x2a1   :  { %v323_v37 = vmul.f32 %v2017_v35, %v303_v25  ;;  %v325_v41 = vmul.f32 %v2023_v39, %v303_v25  ;;  %v327_v45 = vmul.f32 %v2031_v43, %v303_v25  ;;  %v329_v48 = vmul.f32 %v2039_v47, %v303_v25 }
 0x2a2   :  { %v2010_v29 = vpack.i.bf16 %v303_v25, %v298_v28  ;;  %v322_v30 = vmul.f32 %v2008_v27, %v298_v28  ;;  %v324_v38 = vmul.f32 %v2019_v36, %v298_v28  ;;  %v326_v42 = vmul.f32 %v2026_v40, %v298_v28 }
 0x2a3   :  { %v328_v46 = vmul.f32 %v2034_v44, %v298_v28 }
 0x2a4   :  { %1881 = vrot.lane.b32.xlu0 %v2010_v29, %s1959_s0  ;;  %1714 = vmatprep.mubr.msk.f32.mxu0 %vm131_vm4, %v322_v30 }
 0x316   :  { %v1882_v31 = vpop.permute.xlu0 %1881 }
 0x317   :  { %v1884_v32 = vunpack.i.h.bf16 %v1882_v31  ;;  %v1883_v33 = vunpack.i.l.bf16 %v1882_v31 }
 0x319   :  { %v1825_v34 = vpack.c.bf16 %v1884_v32, %v1883_v33 }
 0x31b   :  { %1827 = vmatprep.subr.msk.bf16.mxu0 %vm1826_vm7, %v1825_v34 }
 0x31c   :  { %1830 = vmatpush3.bf16.xpose.msk.msra.mxu0 %vm1826_vm7, %v1825_v34 }
 0x323   :  { %1715 = vmatmul.mubr.msk.f32.vlgmr.msra.gmra.mrb[2].mxu0 %vm131_vm4, %v323_v37 }
 0x324   :  { %1717 = vmatprep.mubr.msk.f32.mxu0 %vm131_vm4, %v324_v38 }
 0x327   :  { %1718 = vmatmul.mubr.msk.f32.gmra.mrb[4].mxu0 %vm131_vm4, %v325_v41 }
 0x328   :  { %1720 = vmatprep.mubr.msk.f32.mxu0 %vm131_vm4, %v326_v42 }
 0x32b   :  { %1721 = vmatmul.mubr.msk.f32.gmra.mrb[6].mxu0 %vm131_vm4, %v327_v45 }
 0x32c   :  { %1723 = vmatprep.mubr.msk.f32.mxu0 %vm131_vm4, %v328_v46 }
 0x32f   :  { %1724 = vmatmul.mubr.msk.f32.gmra.mrb[8].mxu0 %vm131_vm4, %v329_v48 }
 0x3f6   :  { %v1716_v49 = vpop.f32.mrb[2].mxu0 }
 0x3f7   :  { %v470_v51 = vmul.f32 0.70710677, %v1716_v49  ;;  %v430_v52 = vpop.f32.mrb[3].mxu0 }
 0x3f8   :  { %v469_v54 = vmul.f32 0.70710677, %v430_v52 }
 0x3f9   :  { %v478_v55 = vadd.f32 %v470_v51, %v315_v50 }
 0x3fa   :  { %v1719_v56 = vpop.f32.mrb[4].mxu0  ;;  %v477_v57 = vadd.f32 %v469_v54, %v314_v53 }
 0x3fb   :  { %v472_v59 = vmul.f32 0.70710677, %v1719_v56  ;;  %v440_v60 = vpop.f32.mrb[5].mxu0  ;;  %v489_v61 = vsel %vm485_vm8, %v478_v55, -inf }
 0x3fc   :  { %v471_v62 = vmul.f32 0.70710677, %v440_v60  ;;  %490 = vmax.xlane.f32.xlu1 %v489_v61  ;;  %v486_v63 = vsel %vm485_vm8, %v477_v57, -inf }
 0x3fd   :  { %487 = vmax.xlane.f32.xlu0 %v486_v63  ;;  %v480_v1 = vadd.f32 %v472_v59, %v317_v58 }
 0x3fe   :  { %v1722_v2 = vpop.f32.mrb[6].mxu0  ;;  %v479_v6 = vadd.f32 %v471_v62, %v316_v0 }
 0x3ff   :  { %v474_v3 = vmul.f32 0.70710677, %v1722_v2  ;;  %v450_v4 = vpop.f32.mrb[7].mxu0  ;;  %v495_v5 = vsel %vm485_vm8, %v480_v1, -inf }
 0x400   :  { %496 = vmax.xlane.f32.xlu1 %v495_v5  ;;  %v473_v9 = vmul.f32 0.70710677, %v450_v4  ;;  %v492_v11 = vsel %vm485_vm8, %v479_v6, -inf }
 0x401   :  { %v482_v12 = vadd.f32 %v474_v3, %v319_v7 }
 0x402   :  { %v1725_v8 = vpop.f32.mrb[8].mxu0  ;;  %v481_v16 = vadd.f32 %v473_v9, %v318_v13 }
 0x403   :  { %v460_v10 = vpop.f32.mrb[9].mxu0  ;;  %v501_v15 = vsel %vm485_vm8, %v482_v12, -inf  ;;  %v476_v18 = vmul.f32 0.70710677, %v1725_v8 }
 0x404   :  { %493 = vmax.xlane.f32.xlu1 %v492_v11  ;;  %v475_v14 = vmul.f32 0.70710677, %v460_v10  ;;  %v498_v19 = vsel %vm485_vm8, %v481_v16, -inf }
 0x405   :  { %v484_v25 = vadd.f32 %v476_v18, %v321_v23 }
 0x406   :  { %v483_v20 = vadd.f32 %v475_v14, %v320_v17 }
 0x407   :  { %v507_v26 = vsel %vm485_vm8, %v484_v25, -inf }
 0x408   :  { %502 = vmax.xlane.f32.xlu1 %v501_v15  ;;  %v504_v24 = vsel %vm485_vm8, %v483_v20, -inf }
 0x40c   :  { %499 = vmax.xlane.f32.xlu1 %v498_v19 }
 0x410   :  { %505 = vmax.xlane.f32.xlu1 %v504_v24 }
 0x414   :  { %508 = vmax.xlane.f32.xlu1 %v507_v26 }
 0x489   :  { %v491_v28 = vpop.xlane.xlu1 %490 }
 0x48a   :  { %v511_v30 = vsub.f32 %v478_v55, %v491_v28  ;;  %v488_v31 = vpop.xlane.xlu0 %487 }
 0x48b   :  { %v510_v32 = vsub.f32 %v477_v57, %v488_v31 }
 0x48c   :  { %v520_v33 = vmul.f32 1.442695, %v511_v30 }
 0x48d   :  { %v518_v34 = vmul.f32 1.442695, %v510_v32  ;;  %v497_v37 = vpop.xlane.xlu1 %496 }
 0x48e   :  { %v513_v38 = vsub.f32 %v480_v1, %v497_v37 }
 0x48f   :  { %1892 = vpow2.f32 %v518_v34 }
 0x490   :  { %1894 = vpow2.f32 %v520_v33  ;;  %v524_v41 = vmul.f32 1.442695, %v513_v38 }
 0x491   :  { %v494_v42 = vpop.xlane.xlu1 %493 }
 0x492   :  { %v512_v45 = vsub.f32 %v479_v6, %v494_v42  ;;  %1896 = vpow2.f32 %v524_v41 }
 0x494   :  { %v522_v46 = vmul.f32 1.442695, %v512_v45 }
 0x495   :  { %v503_v48 = vpop.xlane.xlu1 %502 }
 0x496   :  { %1898 = vpow2.f32 %v522_v46  ;;  %v515_v49 = vsub.f32 %v482_v12, %v503_v48 }
 0x498   :  { %v528_v50 = vmul.f32 1.442695, %v515_v49 }
 0x499   :  { %v1893_v51 = vpop.eup %1892  ;;  %v500_v52 = vpop.xlane.xlu1 %499 }
 0x49a   :  { %1900 = vpow2.f32 %v528_v50  ;;  %v514_v53 = vsub.f32 %v481_v16, %v500_v52  ;;  %v534_v54 = vsel %vm485_vm8, %v1893_v51, 0.0  ;;  %v1895_v55 = vpop.eup %1894  ;;  %v723_v50 = vld [vmem:[#allocation2 + $0x30] sm:$0xff] }
 0x49b   :  { %535 = vadd.xlane.f32.xlu1 %v534_v54  ;;  %v537_v59 = vsel %vm485_vm8, %v1895_v55, 0.0 }
 0x49c   :  { %v526_v56 = vmul.f32 1.442695, %v514_v53  ;;  %v1897_v60 = vpop.eup %1896 }
 0x49d   :  { %v506_v57 = vpop.xlane.xlu1 %505  ;;  %v543_v2 = vsel %vm485_vm8, %v1897_v60, 0.0 }
 0x49e   :  { %1902 = vpow2.f32 %v526_v56  ;;  %v516_v58 = vsub.f32 %v483_v20, %v506_v57 }
 0x49f   :  { %538 = vadd.xlane.f32.xlu1 %v537_v59 }
 0x4a0   :  { %v1899_v61 = vpop.eup %1898  ;;  %v530_v62 = vmul.f32 1.442695, %v516_v58 }
 0x4a1   :  { %v509_v63 = vpop.xlane.xlu1 %508  ;;  %v540_v0 = vsel %vm485_vm8, %v1899_v61, 0.0 }
 0x4a2   :  { %1904 = vpow2.f32 %v530_v62  ;;  %v517_v1 = vsub.f32 %v484_v25, %v509_v63  ;;  %541 = vadd.xlane.f32.xlu0 %v540_v0 }
 0x4a3   :  { %544 = vadd.xlane.f32.xlu1 %v543_v2 }
 0x4a4   :  { %v1901_v3 = vpop.eup %1900  ;;  %v532_v4 = vmul.f32 1.442695, %v517_v1 }
 0x4a5   :  { %v549_v5 = vsel %vm485_vm8, %v1901_v3, 0.0 }
 0x4a6   :  { %1906 = vpow2.f32 %v532_v4 }
 0x4a7   :  { %550 = vadd.xlane.f32.xlu1 %v549_v5 }
 0x4a8   :  { %v1903_v6 = vpop.eup %1902 }
 0x4a9   :  { %v546_v7 = vsel %vm485_vm8, %v1903_v6, 0.0 }
 0x4aa   :  { %547 = vadd.xlane.f32.xlu0 %v546_v7 }
 0x4ac   :  { %v1905_v8 = vpop.eup %1904 }
 0x4ad   :  { %v552_v9 = vsel %vm485_vm8, %v1905_v8, 0.0 }
 0x4ae   :  { %553 = vadd.xlane.f32.xlu0 %v552_v9 }
 0x4b0   :  { %v1907_v10 = vpop.eup %1906 }
 0x4b1   :  { %v555_v11 = vsel %vm485_vm8, %v1907_v10, 0.0 }
 0x4b2   :  { %556 = vadd.xlane.f32.xlu1 %v555_v11 }
 0x4c4   :  { %1886 = vrot.lane.b32.xlu0 %v2010_v29, %s1960_s1 }
 0x528   :  { %v536_v12 = vpop.xlane.xlu1 %535 }
 0x529   :  { %1908 = vrcp.f32 %v536_v12 }
 0x52c   :  { %v539_v13 = vpop.xlane.xlu1 %538 }
 0x52d   :  { %1910 = vrcp.f32 %v539_v13 }
 0x52f   :  { %v542_v15 = vpop.xlane.xlu0 %541 }
 0x530   :  { %v545_v18 = vpop.xlane.xlu1 %544  ;;  %1912 = vrcp.f32 %v542_v15 }
 0x531   :  { %1914 = vrcp.f32 %v545_v18 }
 0x533   :  { %v1909_v14 = vpop.eup %1908 }
 0x534   :  { %v566_v16 = vmul.f32 %v1909_v14, %v1893_v51  ;;  %v551_v20 = vpop.xlane.xlu1 %550 }
 0x536   :  { %1730 = vmatprep.mubr.msk.f32.mxu0 %vm485_vm8, %v566_v16 }
 0x537   :  { %v548_v17 = vpop.xlane.xlu0 %547  ;;  %v1911_v28 = vpop.eup %1910 }
 0x538   :  { %1916 = vrcp.f32 %v548_v17  ;;  %v567_v31 = vmul.f32 %v1911_v28, %v1895_v55  ;;  %v1575_v28 = vld [vmem:[#allocation2 + $0x40] ss:$0 sm:$0xff] }
 0x539   :  { %1918 = vrcp.f32 %v551_v20 }
 0x53a   :  { %v1913_v30 = vpop.eup %1912 }
 0x53b   :  { %v554_v19 = vpop.xlane.xlu0 %553  ;;  %v1915_v32 = vpop.eup %1914  ;;  %v568_v33 = vmul.f32 %v1913_v30, %v1899_v61 }
 0x53c   :  { %1920 = vrcp.f32 %v554_v19  ;;  %v569_v37 = vmul.f32 %v1915_v32, %v1897_v60  ;;  %v853_v19 = vld [vmem:[#allocation2 + $0x50] sm:$0xff] }
 0x53d   :  { %1747 = vmatprep.subr.mxu1 %v853_v19 }
 0x53e   :  { %1748 = vmatpush3.msra.mxu1 %v853_v19 }
 0x53f   :  { %v1887_v23 = vpop.permute.xlu0 %1886  ;;  %v557_v26 = vpop.xlane.xlu1 %556 }
 0x540   :  { %v1889_v24 = vunpack.i.h.bf16 %v1887_v23  ;;  %v1888_v25 = vunpack.i.l.bf16 %v1887_v23  ;;  %1922 = vrcp.f32 %v557_v26 }
 0x542   :  { %v1831_v29 = vpack.c.bf16 %v1889_v24, %v1888_v25  ;;  %v1917_v34 = vpop.eup %1916 }
 0x543   :  { %v1919_v38 = vpop.eup %1918  ;;  %v570_v41 = vmul.f32 %v1917_v34, %v1903_v6 }
 0x544   :  { %1832 = vmatprep.subr.bf16.mxu0 %v1831_v29  ;;  %v571_v45 = vmul.f32 %v1919_v38, %v1901_v3 }
 0x545   :  { %1834 = vmatpush3.bf16.msra.mxu0 %v1831_v29 }
 0x546   :  { %v1921_v42 = vpop.eup %1920  ;;  %1742 = vmatprep.subr.mxu0 %v723_v50 }
 0x547   :  { %v572_v48 = vmul.f32 %v1921_v42, %v1905_v8  ;;  %v942_v42 = vld [vmem:[#allocation2 + $0x60] sm:$0xff] }
 0x548   :  { %1731 = vmatmul.mubr.msk.f32.vlgmr.msra.gmra.mrb[10].mxu0 %vm485_vm8, %v567_v31  ;;  %v1576_v31 = vld [vmem:[#allocation2 + $0x48] ss:$0 sm:$0xff] }
 0x549   :  { %1733 = vmatprep.mubr.msk.f32.mxu0 %vm485_vm8, %v568_v33  ;;  %1743 = vmatpush3.msra.mxu0 %v723_v50 }
 0x54a   :  { %v1923_v46 = vpop.eup %1922  ;;  %1752 = vmatprep.subr.mxu0 %v942_v42 }
 0x54b   :  { %v573_v49 = vmul.f32 %v1923_v46, %v1907_v10 }
 0x54c   :  { %1734 = vmatmul.mubr.msk.f32.gmra.mrb[12].mxu0 %vm485_vm8, %v569_v37 }
 0x54d   :  { %1736 = vmatprep.mubr.msk.f32.mxu0 %vm485_vm8, %v570_v41 }
 0x550   :  { %1737 = vmatmul.mubr.msk.f32.gmra.mrb[14].mxu0 %vm485_vm8, %v571_v45  ;;  %v1577_v45 = vld [vmem:[#allocation2 + $0x58] ss:$0 sm:$0xff] }
 0x551   :  { %1739 = vmatprep.mubr.msk.f32.mxu0 %vm485_vm8, %v572_v48 }
 0x554   :  { %1740 = vmatmul.mubr.msk.f32.gmra.mrb[16].mxu0 %vm485_vm8, %v573_v49 }
 0x61b   :  { %v1732_v51 = vpop.f32.mrb[10].mxu0 }
 0x61c   :  { %v670_v52 = vpop.f32.mrb[11].mxu0  ;;  %v710_v54 = vmul.f32 %v1732_v51, %v2017_v35 }
 0x61d   :  { %v709_v57 = vmul.f32 %v670_v52, %v2008_v27 }
 0x61f   :  { %v1735_v53 = vpop.f32.mrb[12].mxu0 }
 0x620   :  { %v712_v55 = vmul.f32 %v1735_v53, %v2023_v39  ;;  %v680_v56 = vpop.f32.mrb[13].mxu0  ;;  %v1580_v53 = vld [vmem:[#allocation2 + $0x68] ss:$0 sm:$0xff] }
 0x621   :  { %v711_v58 = vmul.f32 %v680_v56, %v2019_v36  ;;  %v1572_v36 = vld [vmem:[#allocation2 + $0x38] ss:$0 sm:$0xff] }
 0x622   :  { %v718_v59 = vadd.f32 %v712_v55, %v710_v54 }
 0x623   :  { %v717_v60 = vadd.f32 %v711_v58, %v709_v57  ;;  %v1738_v61 = vpop.f32.mrb[14].mxu0 }
 0x624   :  { %v714_v62 = vmul.f32 %v1738_v61, %v2031_v43  ;;  %v690_v63 = vpop.f32.mrb[15].mxu0 }
 0x625   :  { %v713_v0 = vmul.f32 %v690_v63, %v2026_v40 }
 0x626   :  { %v720_v1 = vadd.f32 %v718_v59, %v714_v62 }
 0x627   :  { %v719_v2 = vadd.f32 %v717_v60, %v713_v0  ;;  %v1741_v3 = vpop.f32.mrb[16].mxu0 }
 0x628   :  { %v716_v35 = vmul.f32 %v1741_v3, %v2039_v47  ;;  %v700_v4 = vpop.f32.mrb[17].mxu0 }
 0x629   :  { %v715_v39 = vmul.f32 %v700_v4, %v2034_v44 }
 0x62a   :  { %v722_v5 = vadd.f32 %v720_v1, %v716_v35 }
 0x62b   :  { %v721_v27 = vadd.f32 %v719_v2, %v715_v39 }
 0x62d   :  { %1744 = vmatprep.mubr.msk.f32.mxu0 %vm131_vm4, %v721_v27  ;;  %v1065_v27 = vld [vmem:[#allocation2 + $0x80] sm:$0xff] }
 0x62e   :  { %1745 = vmatmul.mubr.msk.f32.vlgmr.msra.gmra.mrb[18].mxu0 %vm131_vm4, %v722_v5  ;;  %1757 = vmatprep.subr.mxu1 %v1065_v27 }
 0x62f   :  { %1753 = vmatpush3.xpose.msra.mxu0 %v942_v42  ;;  %v1963_v42 = vmov 0.0  }
 0x701   :  { %v1746_v6 = vpop.f32.mrb[18].mxu0 }
 0x702   :  { %v801_v43 = vpop.f32.mrb[19].mxu0  ;;  %v807_v7 = vadd.f32 %v1746_v6, %v1572_v36 }
 0x703   :  { %v802_v8 = vadd.f32 %v1572_v36, %v801_v43 }
 0x704   :  { %v811_v47 = vadd.f32 %v807_v7, %v2004_v22 }
 0x705   :  { %v810_v40 = vadd.f32 %v802_v8, %v2000_v21 }
 0x706   :  { %v817_v44 = vsel %vm131_vm4, %v811_v47, 0.0 }
 0x707   :  { %v814_v9 = vsel %vm131_vm4, %v810_v40, 0.0 }
 0x708   :  { %815 = vadd.xlane.f32.xlu1 %v814_v9 }
 0x70c   :  { %818 = vadd.xlane.f32.xlu1 %v817_v44 }
 0x795   :  { %v816_v10 = vpop.xlane.xlu1 %815 }
 0x796   :  { %v821_v11 = vmul.f32 0.125, %v816_v10  ;;  %v1582_v10 = vld [vmem:[#allocation2 + $0x78] ss:$0 sm:$0xff] }
 0x798   :  { %v823_v12 = vsub.f32 %v810_v40, %v821_v11 }
 0x799   :  { %v819_v13 = vpop.xlane.xlu1 %818 }
 0x79a   :  { %v822_v14 = vmul.f32 0.125, %v819_v13  ;;  %v825_v15 = vmul.f32 %v823_v12, %v823_v12 }
 0x79c   :  { %v824_v16 = vsub.f32 %v811_v47, %v822_v14  ;;  %v827_v17 = vsel %vm131_vm4, %v825_v15, 0.0  ;;  %v1581_v47 = vld [vmem:[#allocation2 + $0x70] ss:$0 sm:$0xff] }
 0x79d   :  { %828 = vadd.xlane.f32.xlu1 %v827_v17  ;;  %v1147_v17 = vld [vmem:[#allocation2 + $0x120] sm:$0xff] }
 0x79e   :  { %v826_v18 = vmul.f32 %v824_v16, %v824_v16 }
 0x7a0   :  { %v830_v21 = vsel %vm131_vm4, %v826_v18, 0.0 }
 0x7a1   :  { %831 = vadd.xlane.f32.xlu1 %v830_v21 }
 0x82a   :  { %v829_v22 = vpop.xlane.xlu1 %828 }
 0x82b   :  { %v833_v20 = vmul.f32 0.125, %v829_v22  ;;  %v1148_v22 = vld [vmem:[#allocation2 + $0x128] sm:$0xff] }
 0x82d   :  { %v835_v23 = vadd.f32 1e-05, %v833_v20  ;;  %v1149_v20 = vld [vmem:[#allocation2 + $0x130] sm:$0xff] }
 0x82e   :  { %v832_v24 = vpop.xlane.xlu1 %831 }
 0x82f   :  { %1924 = vrsqrt.f32 %v835_v23  ;;  %v834_v25 = vmul.f32 0.125, %v832_v24  ;;  %v1150_v23 = vld [vmem:[#allocation2 + $0x138] sm:$0xff]  ;;  %v1151_v24 = vld [vmem:[#allocation2 + $0x140] sm:$0xff] }
 0x831   :  { %v836_v29 = vadd.f32 1e-05, %v834_v25  ;;  %v1152_v25 = vld [vmem:[#allocation2 + $0x148] sm:$0xff] }
 0x833   :  { %1926 = vrsqrt.f32 %v836_v29  ;;  %v1153_v29 = vld [vmem:[#allocation2 + $0x150] sm:$0xff] }
 0x839   :  { %v1925_v26 = vpop.eup %1924 }
 0x83a   :  { %v839_v30 = vmul.f32 %v1925_v26, %v823_v12  ;;  %v1154_v26 = vld [vmem:[#allocation2 + $0x158] sm:$0xff] }
 0x83c   :  { %v845_v32 = vmul.f32 %v1575_v28, %v839_v30  ;;  %v1156_v30 = vld [vmem:[#allocation2 + $0x168] sm:$0xff] }
 0x83d   :  { %v1927_v33 = vpop.eup %1926 }
 0x83e   :  { %v840_v34 = vmul.f32 %v1927_v33, %v824_v16  ;;  %v851_v37 = vadd.f32 %v1576_v31, %v845_v32  ;;  %v1158_v32 = vld [vmem:[#allocation2 + $0x178] sm:$0xff]  ;;  %v1159_v33 = vld [vmem:[#allocation2 + $0x180] sm:$0xff] }
 0x840   :  { %v846_v38 = vmul.f32 %v1575_v28, %v840_v34  ;;  %1749 = vmatprep.mubr.msk.f32.mxu1 %vm131_vm4, %v851_v37  ;;  %v1155_v28 = vld [vmem:[#allocation2 + $0x160] sm:$0xff]  ;;  %v1160_v34 = vld [vmem:[#allocation2 + $0x188] sm:$0xff] }
 0x842   :  { %v852_v41 = vadd.f32 %v1576_v31, %v846_v38  ;;  %v1157_v31 = vld [vmem:[#allocation2 + $0x170] sm:$0xff]  ;;  %v1162_v38 = vld [vmem:[#allocation2 + $0x198] sm:$0xff] }
 0x844   :  { %1750 = vmatmul.mubr.msk.f32.vlgmr.msra.gmra.mrb[4].mxu1 %vm131_vm4, %v852_v41 }
 0x845   :  { %1758 = vmatpush3.msra.mxu1 %v1065_v27 }
 0x917   :  { %v1751_v46 = vpop.f32.mrb[4].mxu1 }
 0x918   :  { %v937_v48 = vadd.f32 %v1751_v46, %v1577_v45  ;;  %v931_v49 = vpop.f32.mrb[5].mxu1  ;;  %v1964_v46 = vmov 0  }
 0x919   :  { %v932_v50 = vadd.f32 %v1577_v45, %v931_v49  ;;  %v1410_v45 = vld [vmem:[#allocation2 + $0x98] sm:$0xff]  ;;  %1890 = vset.pattern.permute.xlu1 %v1964_v46  ;;  %1891 = vset.pattern.permute.xlu0 %v1964_v46 }
 0x91a   :  { %v941_v52 = vmax.f32 %v937_v48, 0.0  ;;  %v2111_v48 = vld [vmem:[#allocation2 + $0x88] ss:$0 sm:$0xff] }
 0x91b   :  { %v940_v51 = vmax.f32 %v932_v50, 0.0 }
 0x91d   :  { %1754 = vmatprep.mubr.f32.mxu0 %v940_v51 }
 0x91e   :  { %1755 = vmatmul.mubr.f32.vlgmr.msra.gmra.mrb[20].mxu0 %v941_v52 }
 0x91f   :  { %1766 = vmatprep.mubr.msk.f32.mxu0 %vm485_vm8, %v1147_v17 }
 0x9f1   :  { %v1756_v54 = vpop.f32.mrb[20].mxu0 }
 0x9f2   :  { %v1014_v55 = vpop.f32.mrb[21].mxu0  ;;  %v1020_v56 = vadd.f32 %v1756_v54, %v1580_v53 }
 0x9f3   :  { %v1015_v57 = vadd.f32 %v1580_v53, %v1014_v55 }
 0x9f4   :  { %v1024_v60 = vadd.f32 %v1020_v56, %v852_v41  ;;  %v1961_v41 = vmov 0.0|0.0  }
 0x9f5   :  { %v1023_v58 = vadd.f32 %v1015_v57, %v851_v37  ;;  %v1161_v37 = vld [vmem:[#allocation2 + $0x190] sm:$0xff]  ;;  %1839 = vmatprep.subr.bf16.mxu1 %v1961_v41 }
 0x9f6   :  { %v1030_v61 = vsel %vm131_vm4, %v1024_v60, 0.0 }
 0x9f7   :  { %v1027_v59 = vsel %vm131_vm4, %v1023_v58, 0.0 }
 0x9f8   :  { %1028 = vadd.xlane.f32.xlu1 %v1027_v59 }
 0x9fc   :  { %1031 = vadd.xlane.f32.xlu1 %v1030_v61 }
 0xa85   :  { %v1029_v62 = vpop.xlane.xlu1 %1028 }
 0xa86   :  { %v1033_v63 = vmul.f32 0.125, %v1029_v62 }
 0xa88   :  { %v1035_v0 = vsub.f32 %v1023_v58, %v1033_v63 }
 0xa89   :  { %v1032_v1 = vpop.xlane.xlu1 %1031 }
 0xa8a   :  { %v1034_v2 = vmul.f32 0.125, %v1032_v1  ;;  %v1037_v3 = vmul.f32 %v1035_v0, %v1035_v0 }
 0xa8c   :  { %v1036_v35 = vsub.f32 %v1024_v60, %v1034_v2  ;;  %v1039_v4 = vsel %vm131_vm4, %v1037_v3, 0.0 }
 0xa8d   :  { %1040 = vadd.xlane.f32.xlu0 %v1039_v4 }
 0xa8e   :  { %v1038_v39 = vmul.f32 %v1036_v35, %v1036_v35 }
 0xa90   :  { %v1042_v5 = vsel %vm131_vm4, %v1038_v39, 0.0 }
 0xa91   :  { %1043 = vadd.xlane.f32.xlu1 %v1042_v5 }
 0xaa2   :  { %1413 = vperm.xlu1 %1890, %v1410_v45  }
 0xb1a   :  { %v1041_v36 = vpop.xlane.xlu0 %1040 }
 0xb1b   :  { %v1045_v6 = vmul.f32 0.125, %v1041_v36 }
 0xb1d   :  { %v1047_v43 = vadd.f32 1e-05, %v1045_v6 }
 0xb1e   :  { %v1044_v7 = vpop.xlane.xlu1 %1043 }
 0xb1f   :  { %1928 = vrsqrt.f32 %v1047_v43  ;;  %v1046_v8 = vmul.f32 0.125, %v1044_v7 }
 0xb21   :  { %v1048_v40 = vadd.f32 1e-05, %v1046_v8 }
 0xb23   :  { %1930 = vrsqrt.f32 %v1048_v40 }
 0xb29   :  { %v1929_v9 = vpop.eup %1928 }
 0xb2a   :  { %v1051_v44 = vmul.f32 %v1929_v9, %v1035_v0 }
 0xb2c   :  { %v1057_v11 = vmul.f32 %v1581_v47, %v1051_v44 }
 0xb2d   :  { %v1931_v12 = vpop.eup %1930 }
 0xb2e   :  { %v1052_v13 = vmul.f32 %v1931_v12, %v1036_v35  ;;  %v1063_v14 = vadd.f32 %v1582_v10, %v1057_v11 }
 0xb30   :  { %v1058_v15 = vmul.f32 %v1581_v47, %v1052_v13  ;;  %1759 = vmatprep.mubr.msk.f32.mxu1 %vm131_vm4, %v1063_v14 }
 0xb32   :  { %v1064_v16 = vadd.f32 %v1582_v10, %v1058_v15 }
 0xb34   :  { %1760 = vmatmul.mubr.msk.f32.vlgmr.msra.gmra.mrb[6].mxu1 %vm131_vm4, %v1064_v16 }
 0xb35   :  { %1822 = vmatprep.mubr.msk.f32.mxu1 %vm1962_vm9, %v1963_v42 }
 0xc07   :  { %v1761_v18 = vpop.f32.mrb[6].mxu1 }
 0xc08   :  { %v1138_v21 = vpop.f32.mrb[7].mxu1 }
 0xc09   :  { %v1835_v19 = vpack.c.bf16 %v1761_v18, %v1138_v21 }
 0xc0b   :  { %1836 = vmatprep.subr.bf16.mxu0 %v1835_v19 }
 0xc0c   :  { %1838 = vmatpush3.bf16.msra.mxu0 %v1835_v19 }
 0xc0f   :  { %1767 = vmatmul.mubr.msk.f32.vlgmr.msra.gmra.mrb[22].mxu0 %vm485_vm8, %v1148_v22 }
 0xc10   :  { %1769 = vmatprep.mubr.msk.f32.mxu0 %vm485_vm8, %v1149_v20 }
 0xc13   :  { %1770 = vmatmul.mubr.msk.f32.gmra.mrb[24].mxu0 %vm485_vm8, %v1150_v23 }
 0xc14   :  { %1772 = vmatprep.mubr.msk.f32.mxu0 %vm485_vm8, %v1151_v24 }
 0xc17   :  { %1773 = vmatmul.mubr.msk.f32.gmra.mrb[26].mxu0 %vm485_vm8, %v1152_v25 }
 0xc18   :  { %1775 = vmatprep.mubr.msk.f32.mxu0 %vm485_vm8, %v1153_v29 }
 0xc1b   :  { %1776 = vmatmul.mubr.msk.f32.gmra.mrb[28].mxu0 %vm485_vm8, %v1154_v26 }
 0xc1c   :  { %1778 = vmatprep.mubr.msk.f32.mxu0 %vm485_vm8, %v1155_v28 }
 0xc1f   :  { %1779 = vmatmul.mubr.msk.f32.gmra.mrb[30].mxu0 %vm485_vm8, %v1156_v30 }
 0xc20   :  { %1781 = vmatprep.mubr.msk.f32.mxu0 %vm485_vm8, %v1157_v31 }
 0xc23   :  { %1782 = vmatmul.mubr.msk.f32.gmra.mrb[32].mxu0 %vm485_vm8, %v1158_v32 }
 0xc24   :  { %1784 = vmatprep.mubr.msk.f32.mxu0 %vm485_vm8, %v1159_v33 }
 0xc27   :  { %1785 = vmatmul.mubr.msk.f32.gmra.mrb[34].mxu0 %vm485_vm8, %v1160_v34 }
 0xc28   :  { %1787 = vmatprep.mubr.msk.f32.mxu0 %vm485_vm8, %v1161_v37 }
 0xc2b   :  { %1788 = vmatmul.mubr.msk.f32.gmra.mrb[36].mxu0 %vm485_vm8, %v1162_v38 }
 0xce2   :  { %v1768_v49 = vpop.f32.mrb[22].mxu0 }
 0xce3   :  { %v1288_v50 = vadd.f32 %v1768_v49, %v2111_v48  ;;  %v1282_v51 = vpop.f32.mrb[23].mxu0 }
 0xce4   :  { %v1283_v52 = vadd.f32 %v2111_v48, %v1282_v51 }
 0xce5   :  { %vm1362_vm10 = vcmp.ge.f32.partialorder %v1288_v50, 0.0  ;;  %v1378_v53 = vmul.f32 0.1, %v1288_v50 }
 0xce6   :  { %vm1361_vm12 = vcmp.ge.f32.partialorder %v1283_v52, 0.0  ;;  %v1377_v54 = vmul.f32 0.1, %v1283_v52  ;;  %v1771_v55 = vpop.f32.mrb[24].mxu0 }
 0xce7   :  { %v1394_v56 = vsel %vm1362_vm10, %v1288_v50, %v1378_v53  ;;  %v1298_v57 = vadd.f32 %v1771_v55, %v2111_v48  ;;  %v1292_v58 = vpop.f32.mrb[25].mxu0 }
 0xce8   :  { %v1393_v59 = vsel %vm1361_vm12, %v1283_v52, %v1377_v54  ;;  %v1293_v60 = vadd.f32 %v2111_v48, %v1292_v58 }
 0xce9   :  { %v1840_v62 = vpack.c.bf16 %v1394_v56, %v1393_v59  ;;  %vm1364_vm14 = vcmp.ge.f32.partialorder %v1298_v57, 0.0  ;;  %v1380_v63 = vmul.f32 0.1, %v1298_v57 }
 0xcea   :  { %vm1363_vm15 = vcmp.ge.f32.partialorder %v1293_v60, 0.0  ;;  %v1379_v0 = vmul.f32 0.1, %v1293_v60  ;;  %v1774_v1 = vpop.f32.mrb[26].mxu0 }
 0xceb   :  { %v1396_v2 = vsel %vm1364_vm14, %v1298_v57, %v1380_v63  ;;  %1842 = vmatpush3.bf16.xpose.msk.msra.mxu1 %vm2119_vm13, %v1840_v62  ;;  %v1308_v3 = vadd.f32 %v1774_v1, %v2111_v48  ;;  %v1302_v35 = vpop.f32.mrb[27].mxu0 }
 0xcec   :  { %v1395_v4 = vsel %vm1363_vm15, %v1293_v60, %v1379_v0  ;;  %1843 = vmatprep.subr.bf16.mxu1 %v1961_v41  ;;  %v1303_v39 = vadd.f32 %v2111_v48, %v1302_v35  ;;  %v1414_v60 = vpop.permute.xlu1 %1413 }
 0xced   :  { %v1844_v5 = vpack.c.bf16 %v1396_v2, %v1395_v4  ;;  %vm1366_vm0 = vcmp.ge.f32.partialorder %v1308_v3, 0.0  ;;  %v1382_v27 = vmul.f32 0.1, %v1308_v3 }
 0xcee   :  { %vm1365_vm1 = vcmp.ge.f32.partialorder %v1303_v39, 0.0  ;;  %v1381_v36 = vmul.f32 0.1, %v1303_v39  ;;  %v1777_v6 = vpop.f32.mrb[28].mxu0 }
 0xcef   :  { %v1398_v43 = vsel %vm1366_vm0, %v1308_v3, %v1382_v27  ;;  %v1318_v7 = vadd.f32 %v1777_v6, %v2111_v48  ;;  %v1312_v8 = vpop.f32.mrb[29].mxu0 }
 0xcf0   :  { %v1397_v40 = vsel %vm1365_vm1, %v1303_v39, %v1381_v36  ;;  %v1313_v9 = vadd.f32 %v2111_v48, %v1312_v8 }
 0xcf1   :  { %v1848_v47 = vpack.c.bf16 %v1398_v43, %v1397_v40  ;;  %vm1368_vm2 = vcmp.ge.f32.partialorder %v1318_v7, 0.0  ;;  %v1384_v44 = vmul.f32 0.1, %v1318_v7 }
 0xcf2   :  { %vm1367_vm3 = vcmp.ge.f32.partialorder %v1313_v9, 0.0  ;;  %v1383_v10 = vmul.f32 0.1, %v1313_v9  ;;  %v1780_v11 = vpop.f32.mrb[30].mxu0 }
 0xcf3   :  { %1846 = vmatpush3.bf16.xpose.msk.msra.mxu1 %vm2119_vm13, %v1844_v5  ;;  %v1400_v12 = vsel %vm1368_vm2, %v1318_v7, %v1384_v44  ;;  %v1328_v13 = vadd.f32 %v1780_v11, %v2111_v48  ;;  %v1322_v14 = vpop.f32.mrb[31].mxu0 }
 0xcf4   :  { %1847 = vmatprep.subr.bf16.mxu1 %v1961_v41  ;;  %v1399_v15 = vsel %vm1367_vm3, %v1313_v9, %v1383_v10  ;;  %v1323_v16 = vadd.f32 %v2111_v48, %v1322_v14 }
 0xcf5   :  { %v1852_v17 = vpack.c.bf16 %v1400_v12, %v1399_v15  ;;  %vm1370_vm4 = vcmp.ge.f32.partialorder %v1328_v13, 0.0  ;;  %v1386_v18 = vmul.f32 0.1, %v1328_v13 }
 0xcf6   :  { %vm1369_vm5 = vcmp.ge.f32.partialorder %v1323_v16, 0.0  ;;  %v1385_v21 = vmul.f32 0.1, %v1323_v16  ;;  %v1783_v19 = vpop.f32.mrb[32].mxu0 }
 0xcf7   :  { %v1402_v22 = vsel %vm1370_vm4, %v1328_v13, %v1386_v18  ;;  %v1338_v20 = vadd.f32 %v1783_v19, %v2111_v48  ;;  %v1332_v23 = vpop.f32.mrb[33].mxu0 }
 0xcf8   :  { %v1401_v24 = vsel %vm1369_vm5, %v1323_v16, %v1385_v21  ;;  %v1333_v25 = vadd.f32 %v2111_v48, %v1332_v23 }
 0xcf9   :  { %v1856_v29 = vpack.c.bf16 %v1402_v22, %v1401_v24  ;;  %vm1372_vm6 = vcmp.ge.f32.partialorder %v1338_v20, 0.0  ;;  %v1388_v26 = vmul.f32 0.1, %v1338_v20 }
 0xcfa   :  { %vm1371_vm7 = vcmp.ge.f32.partialorder %v1333_v25, 0.0  ;;  %v1387_v28 = vmul.f32 0.1, %v1333_v25  ;;  %v1786_v30 = vpop.f32.mrb[34].mxu0 }
 0xcfb   :  { %1850 = vmatpush3.bf16.xpose.msk.msra.mxu1 %vm2119_vm13, %v1848_v47  ;;  %v1404_v31 = vsel %vm1372_vm6, %v1338_v20, %v1388_v26  ;;  %v1348_v32 = vadd.f32 %v1786_v30, %v2111_v48  ;;  %v1342_v33 = vpop.f32.mrb[35].mxu0 }
 0xcfc   :  { %1851 = vmatprep.subr.bf16.mxu1 %v1961_v41  ;;  %v1403_v34 = vsel %vm1371_vm7, %v1333_v25, %v1387_v28  ;;  %v1343_v37 = vadd.f32 %v2111_v48, %v1342_v33 }
 0xcfd   :  { %v1860_v38 = vpack.c.bf16 %v1404_v31, %v1403_v34  ;;  %vm1374_vm8 = vcmp.ge.f32.partialorder %v1348_v32, 0.0  ;;  %v1390_v42 = vmul.f32 0.1, %v1348_v32 }
 0xcfe   :  { %vm1373_vm9 = vcmp.ge.f32.partialorder %v1343_v37, 0.0  ;;  %v1389_v45 = vmul.f32 0.1, %v1343_v37  ;;  %v1789_v46 = vpop.f32.mrb[36].mxu0 }
 0xcff   :  { %v1406_v49 = vsel %vm1374_vm8, %v1348_v32, %v1390_v42  ;;  %v1358_v50 = vadd.f32 %v1789_v46, %v2111_v48  ;;  %v1352_v51 = vpop.f32.mrb[37].mxu0 }
 0xd00   :  { %v1405_v52 = vsel %vm1373_vm9, %v1343_v37, %v1389_v45  ;;  %v1353_v53 = vadd.f32 %v2111_v48, %v1352_v51  ;;  %v1409_v48 = vld [vmem:[#allocation2 + $0x90] sm:$0xff] }
 0xd01   :  { %v1864_v54 = vpack.c.bf16 %v1406_v49, %v1405_v52  ;;  %vm1376_vm10 = vcmp.ge.f32.partialorder %v1358_v50, 0.0  ;;  %v1392_v55 = vmul.f32 0.1, %v1358_v50 }
 0xd02   :  { %vm1375_vm12 = vcmp.ge.f32.partialorder %v1353_v53, 0.0  ;;  %v1391_v56 = vmul.f32 0.1, %v1353_v53 }
 0xd03   :  { %1854 = vmatpush3.bf16.xpose.msk.msra.mxu1 %vm2119_vm13, %v1852_v17  ;;  %v1408_v57 = vsel %vm1376_vm10, %v1358_v50, %v1392_v55 }
 0xd04   :  { %1855 = vmatprep.subr.bf16.mxu1 %v1961_v41  ;;  %v1407_v58 = vsel %vm1375_vm12, %v1353_v53, %v1391_v56 }
 0xd05   :  { %v1868_v59 = vpack.c.bf16 %v1408_v57, %v1407_v58 }
 0xd0b   :  { %1858 = vmatpush3.bf16.xpose.msk.msra.mxu1 %vm2119_vm13, %v1856_v29 }
 0xd0c   :  { %1859 = vmatprep.subr.bf16.mxu1 %v1961_v41 }
 0xd13   :  { %1862 = vmatpush3.bf16.xpose.msk.msra.mxu1 %vm2119_vm13, %v1860_v38 }
 0xd14   :  { %1863 = vmatprep.subr.bf16.mxu1 %v1961_v41 }
 0xd1b   :  { %1866 = vmatpush3.bf16.xpose.msk.msra.mxu1 %vm2119_vm13, %v1864_v54 }
 0xd1c   :  { %1867 = vmatprep.subr.bf16.mxu1 %v1961_v41 }
 0xd23   :  { %1870 = vmatpush3.bf16.xpose.msk.msra.mxu1 %vm2119_vm13, %v1868_v59 }
 0xd2a   :  { %1823 = vmatmul.mubr.msk.f32.vlgmr.msra.gmra.mrb[8].mxu1 %vm1416_vm11, %v1409_v48 }
 0xdfd   :  { %v1534_v62 = vpop.f32.mrb[8].mxu1 }
 0xdfe   :  { %v1824_v63 = vpop.f32.mrb[9].mxu1  ;;  %v1535_v0 = vadd.f32 %v1534_v62, %v1414_v60 }
 0xe00   :  { %1538 = vst [vmem:[%s2164_s2] sm:$0xff] %v1535_v0 }
 0xe01   :  { %1543 = vsyncpa [#allocation3], 1 }

</bundles_post_ra>
